<compile_context>
chip_gen: v7x
topology: tpu7x:2x2x1
jax: 0.10.0
libtpu: 0.0.40
codegen_flags: <defaults>
</compile_context>

<pallas_src>
import jax
import jax.numpy as jnp
from jax.experimental import pallas as pl
from jax.experimental.pallas import tpu as pltpu


def _round_up(x, m):
    return ((x + m - 1) // m) * m


def _critic_kernel(state_ref, action_ref, w1s_ref, w1a_ref, b1_ref, w2_ref,
                   b2_ref, out_ref):
    # Layer 1: fused "concat matmul" — two MXU pushes against the split weight,
    # f32 accumulation, bias + ReLU on the VPU.
    h = jnp.dot(state_ref[...], w1s_ref[...],
                preferred_element_type=jnp.float32)
    h = h + jnp.dot(action_ref[...], w1a_ref[...],
                    preferred_element_type=jnp.float32)
    h = jnp.maximum(h + b1_ref[...], 0.0)                       # (TILE_B, H)

    # Layer 2: (1, H) x (TILE_B, H)^T with the transpose kept inside the MXU
    # operand path (no materialized h^T).  Result is lane-dense (1, TILE_B),
    # so the store below is a full-lane unmasked write.
    q = pl.dot(w2_ref[...], h, trans_b=True)                    # (1, TILE_B)

    out_ref[...] = (q + b2_ref[0, 0]).astype(out_ref.dtype)


def _select_tile(batch, tile_b):
    """Pick a batch tile.

    * batch < 256  -> a single grid step covering the whole (8-padded) batch.
    * batch >= 256 -> lane-aligned (multiple-of-128) tiles, chosen so there are
      at least 2 tiles (v7x dual-TensorCore sharding) and at most tile_b rows
      per tile (amortize per-step overhead).
    """
    if batch < 256:
        return max(8, _round_up(batch, 8))
    half = (_round_up(batch, 128) // 2 // 128) * 128
    half = max(128, half)
    return min(tile_b, half)


def critic_forward(state, action, w1s, w1a, b1, w2, b2, *, tile_b=2048):
    """Pallas implementation of CriticNetwork.forward(state, action) -> (B, 1)."""
    state = state.astype(jnp.float32)
    action = action.astype(jnp.float32)
    batch, state_dim = state.shape
    action_dim = action.shape[1]
    hidden = w1s.shape[1]
    in_dim = state_dim + action_dim

    tile = _select_tile(batch, tile_b)
    b_pad = _round_up(batch, tile)
    if b_pad != batch:
        pad = b_pad - batch
        state = jnp.pad(state, ((0, pad), (0, 0)))
        action = jnp.pad(action, ((0, pad), (0, 0)))
    num_tiles = b_pad // tile

    # Advisory cost so XLA schedules this tiny call sensibly in the train step.
    cost = pl.CostEstimate(
        flops=int(2 * b_pad * (in_dim * hidden + hidden)),
        transcendentals=0,
        bytes_accessed=int(4 * (b_pad * (state_dim + action_dim + 1)
                                + in_dim * hidden + 2 * hidden + 1)),
    )

    out = pl.pallas_call(
        _critic_kernel,
        out_shape=jax.ShapeDtypeStruct((1, b_pad), jnp.float32),
        grid=(num_tiles,),
        in_specs=[
            # Streamed activations: one batch tile per grid step.
            pl.BlockSpec((tile, state_dim), lambda i: (i, 0)),
            pl.BlockSpec((tile, action_dim), lambda i: (i, 0)),
            # Weights / bias: full arrays pinned to block (0, 0) — fetched once
            # and kept VMEM-resident across the whole grid.
            pl.BlockSpec((state_dim, hidden), lambda i: (0, 0)),
            pl.BlockSpec((action_dim, hidden), lambda i: (0, 0)),
            pl.BlockSpec((1, hidden), lambda i: (0, 0)),
            pl.BlockSpec((1, hidden), lambda i: (0, 0)),
            # Scalar output bias in SMEM.
            pl.BlockSpec(memory_space=pltpu.MemorySpace.SMEM),
        ],
        # Lane-dense output: batch on the lane axis, one (1, tile) row per step.
        out_specs=pl.BlockSpec((1, tile), lambda i: (0, i)),
        compiler_params=pltpu.CompilerParams(
            dimension_semantics=("parallel",)),
        cost_estimate=cost,
    )(state, action, w1s, w1a, b1, w2, b2)

    # Back to the PyTorch (B, 1) layout, dropping padded rows.
    return out[0, :batch][:, None]


def init_critic_params(key, state_dim, action_dim, hidden_size=128):
    """nn.Linear-style init (uniform ±1/sqrt(fan_in)), kernel-friendly layout.

    W1 is split at init into its state / action row blocks, stored as
    (in_features, out_features); W2 is kept as its natural (1, hidden) row;
    b2 is a (1, 1) scalar destined for SMEM.
    """
    in_dim = state_dim + action_dim
    k1, k2, k3, k4 = jax.random.split(key, 4)

    bound1 = 1.0 / jnp.sqrt(jnp.float32(in_dim))
    w1 = jax.random.uniform(k1, (in_dim, hidden_size), jnp.float32,
                            minval=-bound1, maxval=bound1)
    w1s, w1a = w1[:state_dim], w1[state_dim:]
    b1 = jax.random.uniform(k2, (1, hidden_size), jnp.float32,
                            minval=-bound1, maxval=bound1)

    bound2 = 1.0 / jnp.sqrt(jnp.float32(hidden_size))
    w2 = jax.random.uniform(k3, (1, hidden_size), jnp.float32,
                            minval=-bound2, maxval=bound2)
    b2 = jax.random.uniform(k4, (1, 1), jnp.float32,
                            minval=-bound2, maxval=bound2)
    return w1s, w1a, b1, w2, b2


if __name__ == "__main__":
    # BipedalWalker-like dims: state_dim=24, action_dim=4, hidden=128.
    state_dim, action_dim, hidden_size = 24, 4, 128

    key = jax.random.PRNGKey(0)
    k_params = jax.random.fold_in(key, 0)
    w1s, w1a, b1, w2, b2 = init_critic_params(k_params, state_dim, action_dim,
                                              hidden_size)

    def reference(state, action):
        sa = jnp.concatenate([state, action], axis=1)
        w1_full = jnp.concatenate([w1s, w1a], axis=0)
        return jnp.maximum(sa @ w1_full + b1, 0.0) @ w2.T + b2

    # batch=2 exercises the single-step path; batch=300 exercises the
    # multi-tile (lane-aligned, >=2 tiles) path.
    for batch in (2, 300):
        kb = jax.random.fold_in(key, batch)
        k_state, k_action = jax.random.split(kb)
        state = jax.random.normal(k_state, (batch, state_dim), jnp.float32)
        action = jax.random.normal(k_action, (batch, action_dim), jnp.float32)

        q = critic_forward(state, action, w1s, w1a, b1, w2, b2)
        q = jax.block_until_ready(q)

        ref = reference(state, action)
        assert q.shape == (batch, 1)
        assert jnp.allclose(q, ref, atol=1e-5, rtol=1e-5)

    print("KERNEL_OK")
</pallas_src>

<mosaic_0001>
module attributes {stable_mosaic.version = 11 : i64} {
  func.func @_critic_kernel(%arg0: i32, %arg1: memref<8x24xf32, #tpu.memory_space<vmem>>, %arg2: memref<8x4xf32, #tpu.memory_space<vmem>>, %arg3: memref<24x128xf32, #tpu.memory_space<vmem>>, %arg4: memref<4x128xf32, #tpu.memory_space<vmem>>, %arg5: memref<1x128xf32, #tpu.memory_space<vmem>>, %arg6: memref<1x128xf32, #tpu.memory_space<vmem>>, %arg7: memref<1x1xf32, #tpu.memory_space<smem>>, %arg8: memref<1x8xf32, #tpu.memory_space<vmem>>) attributes {dimension_semantics = [#tpu.dimension_semantics<parallel>], iteration_bounds = array<i64: 1>, scalar_prefetch = 0 : i64, scratch_operands = 0 : i64, tpu.core_type = #tpu.core_type<tc>, window_params = [{transform_indices = @transform_0, window_bounds = array<i64: 8, 24>}, {transform_indices = @transform_1, window_bounds = array<i64: 8, 4>}, {pipeline_mode = #tpu.pipeline_mode<synchronous>, transform_indices = @transform_2, window_bounds = array<i64: 24, 128>}, {pipeline_mode = #tpu.pipeline_mode<synchronous>, transform_indices = @transform_3, window_bounds = array<i64: 4, 128>}, {pipeline_mode = #tpu.pipeline_mode<synchronous>, transform_indices = @transform_4, window_bounds = array<i64: 1, 128>}, {pipeline_mode = #tpu.pipeline_mode<synchronous>, transform_indices = @transform_5, window_bounds = array<i64: 1, 128>}, {transform_indices = @transform_6, window_bounds = array<i64: 1, 1>}, {transform_indices = @transform_7, window_bounds = array<i64: 1, 8>}]} {
    %c0 = arith.constant 0 : index
    %c0_0 = arith.constant 0 : index
    %0 = vector.load %arg1[%c0, %c0_0] : memref<8x24xf32, #tpu.memory_space<vmem>>, vector<8x24xf32>
    %c0_1 = arith.constant 0 : index
    %c0_2 = arith.constant 0 : index
    %1 = vector.load %arg3[%c0_1, %c0_2] : memref<24x128xf32, #tpu.memory_space<vmem>>, vector<24x128xf32>
    %cst = arith.constant dense<0.000000e+00> : vector<8x128xf32>
    %2 = tpu.matmul %0, %1, %cst {dimension_numbers = #tpu.dot_dimension_numbers<[1], [0], [0], [1], [0, 0, 1, 1], [], []>} : vector<8x24xf32>, vector<24x128xf32>, vector<8x128xf32> -> vector<8x128xf32>
    %c0_3 = arith.constant 0 : index
    %c0_4 = arith.constant 0 : index
    %3 = vector.load %arg2[%c0_3, %c0_4] : memref<8x4xf32, #tpu.memory_space<vmem>>, vector<8x4xf32>
    %c0_5 = arith.constant 0 : index
    %c0_6 = arith.constant 0 : index
    %4 = vector.load %arg4[%c0_5, %c0_6] : memref<4x128xf32, #tpu.memory_space<vmem>>, vector<4x128xf32>
    %cst_7 = arith.constant dense<0.000000e+00> : vector<8x128xf32>
    %5 = tpu.matmul %3, %4, %cst_7 {dimension_numbers = #tpu.dot_dimension_numbers<[1], [0], [0], [1], [0, 0, 1, 1], [], []>} : vector<8x4xf32>, vector<4x128xf32>, vector<8x128xf32> -> vector<8x128xf32>
    %6 = arith.addf %2, %5 : vector<8x128xf32>
    %c0_8 = arith.constant 0 : index
    %c0_9 = arith.constant 0 : index
    %7 = vector.load %arg5[%c0_8, %c0_9] : memref<1x128xf32, #tpu.memory_space<vmem>>, vector<1x128xf32>
    %8 = vector.broadcast %7 : vector<1x128xf32> to vector<8x128xf32>
    %9 = arith.addf %6, %8 : vector<8x128xf32>
    %cst_10 = arith.constant 0.000000e+00 : f32
    %10 = vector.broadcast %cst_10 : f32 to vector<8x128xf32>
    %11 = arith.maximumf %9, %10 : vector<8x128xf32>
    %c0_11 = arith.constant 0 : index
    %c0_12 = arith.constant 0 : index
    %12 = vector.load %arg6[%c0_11, %c0_12] : memref<1x128xf32, #tpu.memory_space<vmem>>, vector<1x128xf32>
    %cst_13 = arith.constant dense<0.000000e+00> : vector<1x8xf32>
    %13 = tpu.matmul %12, %11, %cst_13 {dimension_numbers = #tpu.dot_dimension_numbers<[1], [1], [0], [0], [0, 0, 1, 0], [], []>} : vector<1x128xf32>, vector<8x128xf32>, vector<1x8xf32> -> vector<1x8xf32>
    %c0_14 = arith.constant 0 : index
    %c0_15 = arith.constant 0 : index
    %14 = memref.load %arg7[%c0_14, %c0_15] : memref<1x1xf32, #tpu.memory_space<smem>>
    %15 = vector.broadcast %14 : f32 to vector<1x8xf32>
    %16 = arith.addf %13, %15 : vector<1x8xf32>
    %c0_16 = arith.constant 0 : index
    %c0_17 = arith.constant 0 : index
    %17 = vector.load %arg8[%c0_16, %c0_17] : memref<1x8xf32, #tpu.memory_space<vmem>>, vector<1x8xf32>
    tpu.vector_store %arg8[%c0_16, %c0_17], %16 {strides = array<i32>} : memref<1x8xf32, #tpu.memory_space<vmem>>, vector<1x8xf32>,
    return
  }
  func.func @transform_0(%arg0: i32) -> (i32, i32) {
    %c0_i32 = arith.constant 0 : i32
    %c0_i32_0 = arith.constant 0 : i32
    return %arg0, %c0_i32 : i32, i32
  }
  func.func @transform_1(%arg0: i32) -> (i32, i32) {
    %c0_i32 = arith.constant 0 : i32
    %c0_i32_0 = arith.constant 0 : i32
    return %arg0, %c0_i32 : i32, i32
  }
  func.func @transform_2(%arg0: i32) -> (i32, i32) {
    %c0_i32 = arith.constant 0 : i32
    %c0_i32_0 = arith.constant 0 : i32
    %c0_i32_1 = arith.constant 0 : i32
    return %c0_i32, %c0_i32_0 : i32, i32
  }
  func.func @transform_3(%arg0: i32) -> (i32, i32) {
    %c0_i32 = arith.constant 0 : i32
    %c0_i32_0 = arith.constant 0 : i32
    %c0_i32_1 = arith.constant 0 : i32
    return %c0_i32, %c0_i32_0 : i32, i32
  }
  func.func @transform_4(%arg0: i32) -> (i32, i32) {
    %c0_i32 = arith.constant 0 : i32
    %c0_i32_0 = arith.constant 0 : i32
    %c0_i32_1 = arith.constant 0 : i32
    return %c0_i32, %c0_i32_0 : i32, i32
  }
  func.func @transform_5(%arg0: i32) -> (i32, i32) {
    %c0_i32 = arith.constant 0 : i32
    %c0_i32_0 = arith.constant 0 : i32
    %c0_i32_1 = arith.constant 0 : i32
    return %c0_i32, %c0_i32_0 : i32, i32
  }
  func.func @transform_6(%arg0: i32) -> (i32, i32) {
    %c0_i32 = arith.constant 0 : i32
    %c0_i32_0 = arith.constant 0 : i32
    %c0_i32_1 = arith.constant 0 : i32
    return %c0_i32, %c0_i32_0 : i32, i32
  }
  func.func @transform_7(%arg0: i32) -> (i32, i32) {
    %c0_i32 = arith.constant 0 : i32
    %c0_i32_0 = arith.constant 0 : i32
    return %c0_i32, %arg0 : i32, i32
  }
}

</mosaic_0001>

<bundles_post_ra>
// kernel: tpu_custom_call.1
= control target key start
LH: loop header
LB: loop body
LE: loop exit
PB: predicated region body
PF: predicated region fallthrough
CT: control target
= control target key end

     0   :  { %13 = vsyncpa [#allocation4], 0  ;;  %s477_s0 = inlined_call_operand.vmem [shape: f32[8,24], index: 0, kind: input, shape index: {}]   ;;  %s478_s1 = inlined_call_operand.vmem [shape: f32[8,4], index: 1, kind: input, shape index: {}]   ;;  %s479_s2 = inlined_call_operand.hbm [shape: f32[24,128], index: 2, kind: input, shape index: {}]   ;;  %s480_s3 = inlined_call_operand.vmem [shape: f32[4,128], index: 3, kind: input, shape index: {}]   ;;  %s481_s4 = inlined_call_operand.vmem [shape: f32[1,128], index: 4, kind: input, shape index: {}]   ;;  %s482_s5 = inlined_call_operand.vmem [shape: f32[1,128], index: 5, kind: input, shape index: {}]   ;;  %s483_s6 = inlined_call_operand.<no memory space> [shape: f32[1,1], index: 6, kind: input, shape index: {}]   ;;  %s484_s7 = inlined_call_operand.hbm [shape: f32[1,8], index: 7, kind: output, shape index: {}]  }
   0x1   :  { %14 = vsyncpa [#allocation5], 0  ;;  %s388_s24 = smov [#allocation3]   ;;  %s340_s28 = scalar_lea.hbm %s479_s2, 384 }
   0x2   :  { %s24_s25 = sshll.u32 %s388_s24, 4  ;;  %p341_p0 = scmp.ne.s32.totalorder %s479_s2, %s340_s28  ;;  %s25_s25 = int_to_ptr.vmem [resolvable:$true] %s24_s25 }
   0x3   :  { %p344_p1 = scmp.lt.u32.totalorder %s340_s28, %s479_s2 }
   0x5   :  { %p346_p2 = pnand %p344_p1, %p341_p0 }
   0x7   :  { %349 = shalt.err (!%p346_p2)
}
   0x8   :  { %s350_s10 = scalar_lea.vmem %s25_s25, 384  ;;  %p355_p4 = scmp.lt.s32.totalorder %s25_s25, %s25_s25 }
   0x9   :  { %p351_p3 = scmp.ne.s32.totalorder %s25_s25, %s350_s10  ;;  %p356_p5 = scmp.lt.s32.totalorder %s350_s10, %s350_s10 }
   0xb   :  { %p357_p6 = por %p356_p5, %p355_p4 }
   0xd   :  { %p358_p7 = pnand %p357_p6, %p351_p3 }
   0xf   :  { %361 = shalt.err (!%p358_p7)
}
  0x10   :  { %s389_s11 = smov 128   ;;  %s390_s12 = smov 8  }
  0x11   :  { %30 = dma.hbm_to_vmem [thread:$0]  %s479_s2, 384, %s25_s25, [#allocation4], %s389_s11, %s389_s11, %s390_s12  }
  0x12   :  { %384 = dma.done.wait [#allocation4], 384  }
  0x13   :  { %385 = vsyncadd [#allocation4], 4294966912  ;;  %v391_v0 = vmov 0.0|0.0   ;;  %v392_v1 = vmov 0.0   ;;  %vm393_vm0 = vmmov 0   ;;  %vm52_vm1 = vcmask 1043456  }
  0x14   :  { %330 = vmatprep.subr.bf16.mxu1 %v391_v0  ;;  %311 = vmatprep.subr.mxu0 %v392_v1  ;;  %vm48_vm2 = vcmask 31744   ;;  %v43_v2 = vld [vmem:[#allocation3] sm:$0xff]  ;;  %v44_v3 = vld [vmem:[#allocation3 + $0x8] sm:$0xff]  ;;  %v45_v7 = vld [vmem:[#allocation3 + $0x10] sm:$0xff]  ;;  %vm126_vm3 = vcmask 195584   ;;  %v211_v18 = vstv %s483_s6  ;;  %s394_s23 = smov [#allocation6]  }
  0x15   :  { %313 = vmatprep.mubr.msk.f32.mxu0 %vm393_vm0, %v392_v1  ;;  %322 = vmatprep.mubr.msk.f32.mxu1 %vm393_vm0, %v392_v1  ;;  %v47_v4 = vld [vmem:[%s480_s3] sm:$0xf]  ;;  %v331_v5 = vpack.c.bf16 %v44_v3, %v43_v2  ;;  %s290_s24 = sshll.u32 %s394_s23, 4  ;;  %vm282_vm4 = vcmask 57344   ;;  %s291_s24 = int_to_ptr.vmem [resolvable:$true] %s290_s24 }
  0x16   :  { %312 = vmatpush3.msk.msra.mxu0 %vm52_vm1, %v47_v4  ;;  %v46_v6 = vld [vmem:[%s478_s1] sm:$0xff]  ;;  %s366_s25 = scalar_lea.vmem %s291_s24, 32  ;;  %p367_p9 = scmp.lt.s32.totalorder %s291_s24, %s291_s24 }
  0x17   :  { %314 = vmatmul.mubr.msk.f32.vlgmr.msra.gmra.mrb[0].mxu0 %vm48_vm2, %v46_v6  ;;  %325 = vmatprep.subr.mxu0 %v392_v1  ;;  %v42_v8 = vld [vmem:[%s477_s0] sm:$0xff] }
  0x18   :  { %332 = vmatpush3.bf16.msra.mxu1 %v331_v5  ;;  %327 = vmatprep.mubr.msk.f32.mxu0 %vm393_vm0, %v392_v1  ;;  %v302_v12 = vld [vmem:[%s481_s4] ss:$0 sm:$0xff]  ;;  %s362_s4 = scalar_lea.vmem %s291_s24, 16 }
  0x19   :  { %320 = vmatprep.subr.mxu1 %v392_v1  ;;  %v209_v17 = vld [vmem:[%s482_s5] sm:$0x1]  ;;  %p363_p8 = scmp.ne.s32.totalorder %s291_s24, %s362_s4  ;;  %p368_p10 = scmp.lt.s32.totalorder %s366_s25, %s362_s4 }
  0x1b   :  { %p369_p11 = por %p368_p10, %p367_p9 }
  0x1c   :  { %321 = vmatpush3.msra.mxu1 %v45_v7 }
  0x1d   :  { %323 = vmatmul.mubr.msk.f32.vlgmr.msra.gmra.mrb[0].mxu1 %vm126_vm3, %v42_v8  ;;  %p370_p12 = pnand %p369_p11, %p363_p8 }
  0xea   :  { %v122_v9 = vpop.f32.mrb[0].mxu0 }
  0xeb   :  { %v315_v10 = vpop.f32.mrb[1].mxu0 }
  0xf0   :  { %v196_v11 = vpop.f32.mrb[0].mxu1 }
  0xf1   :  { %v197_v13 = vadd.f32 %v196_v11, %v122_v9  ;;  %v324_v14 = vpop.f32.mrb[1].mxu1 }
  0xf3   :  { %v207_v15 = vadd.f32 %v302_v12, %v197_v13 }
  0xf5   :  { %v208_v16 = vmax.f32 %v207_v15, 0.0 }
  0xf7   :  { %326 = vmatpush3.xpose.msra.mxu0 %v208_v16 }
  0xfa   :  { %328 = vmatmul.mubr.f32.vlgmr.msra.gmra.mrb[2].mxu0 %v209_v17 }
 0x1cd   :  { %v278_v19 = vpop.f32.mrb[2].mxu0 }
 0x1ce   :  { %v279_v20 = vadd.f32 %v278_v19, %v211_v18  ;;  %v329_v21 = vpop.f32.mrb[3].mxu0 }
 0x1d0   :  { %283 = vst.msk [vmem:[#allocation6] sm:$0x1] %vm282_vm4, %v279_v20 }
 0x1d1   :  { %373 = shalt.err (!%p370_p12)
}
 0x1d2   :  { %s374_s6 = scalar_lea.hbm %s484_s7, 16 }
 0x1d3   :  { %p375_p13 = scmp.ne.s32.totalorder %s484_s7, %s374_s6  ;;  %p378_p0 = scmp.lt.u32.totalorder %s374_s6, %s484_s7 }
 0x1d5   :  { %p380_p1 = pnand %p378_p0, %p375_p13 }
 0x1d7   :  { %383 = shalt.err (!%p380_p1)
}
 0x1d8   :  { %293 = dma.vmem_to_hbm [thread:$0]  %s291_s24, 16, %s484_s7, [#allocation5]  }
 0x1d9   :  { %386 = dma.done.wait [#allocation5], 16  }
 0x1da   :  { %387 = vsyncadd [#allocation5], 4294967280 }
 0x1db   :  { %297 = vsyncpa [#allocation4], 1 }
 0x1dc   :  { %298 = vsyncpa [#allocation5], 1 }

</bundles_post_ra>
